<compile_context>
chip_gen: v7x
topology: tpu7x:2x2x1
jax: 0.10.0
libtpu: 0.0.40
codegen_flags: <defaults>
</compile_context>

<pallas_src>
import functools

import jax
import jax.numpy as jnp
from jax import lax
from jax.experimental import pallas as pl
from jax.experimental.pallas import tpu as pltpu


# ----------------------------- helpers ------------------------------------ #

def _round_up(x, m):
    return (x + m - 1) // m * m


def _gelu_erf(x):
    # Exact GELU (PyTorch nn.GELU() default, approximate='none').
    return 0.5 * x * (1.0 + lax.erf(x * (1.0 / jnp.sqrt(2.0))))


def _gelu_tanh(x):
    # tanh-approximate GELU: transcendental lands on the EUP (separate bundle slot).
    c = 0.7978845608028654  # sqrt(2/pi)
    return 0.5 * x * (1.0 + jnp.tanh(c * (x + 0.044715 * x * x * x)))


def sinusoidal_embedding(t, size, scale=1.0):
    """Matches SinusoidalEmbedding from the reference repo (tiny-diffusion style)."""
    t = t.astype(jnp.float32) * scale
    half = size // 2
    freqs = jnp.exp(-(jnp.log(10000.0) / (half - 1)) *
                    jnp.arange(half, dtype=jnp.float32))
    emb = t[..., None] * freqs[None, :]
    return jnp.concatenate([jnp.sin(emb), jnp.cos(emb)], axis=-1)


# ----------------------------- fused kernel -------------------------------- #

def _fused_mlp_kernel(h0_ref, w_in_ref, b_in_ref, w_blk_ref, b_blk_ref,
                      w_out_ref, b_out_ref, o_ref, *,
                      n_layers, compute_dtype, approximate_gelu):
    """Grid = (batch_tiles,).  Whole network per tile; h never leaves VMEM/vregs."""
    act = _gelu_tanh if approximate_gelu else _gelu_erf

    # Input projection + GELU (bias add / activation in f32).
    h = jnp.dot(h0_ref[...].astype(compute_dtype), w_in_ref[...],
                preferred_element_type=jnp.float32)
    h = act(h + b_in_ref[...])

    # L residual Block_nonorm layers, statically unrolled (L is a trace-time int).
    for l in range(n_layers):
        y = jnp.dot(h.astype(compute_dtype), w_blk_ref[l],
                    preferred_element_type=jnp.float32) + b_blk_ref[l]
        h = h + act(y)

    # Output projection; output tile is lane-padded (dense vst), padding sliced off
    # in the wrapper.
    o = jnp.dot(h.astype(compute_dtype), w_out_ref[...],
                preferred_element_type=jnp.float32) + b_out_ref[...]
    o_ref[...] = o.astype(o_ref.dtype)


def fused_mlp_nonorm(h0, w_in, b_in, w_blocks, b_blocks, w_out, b_out,
                     *, block_rows=1024, compute_dtype="bfloat16",
                     approximate_gelu=False):
    """h0: (B, C) pre-concatenated [x, t_emb].  Returns (B, ndim) float32."""
    compute_dtype = jnp.dtype(compute_dtype)
    B, C = h0.shape
    H = w_in.shape[1]
    N = w_out.shape[1]
    L = int(w_blocks.shape[0])
    L_stack = max(L, 1)          # weight stack must be non-empty to DMA; unused if L==0

    # Lane-friendly padding of C, H, N (zero rows/cols + zero bias => no-op math).
    Cp = _round_up(C, 128)
    Hp = _round_up(H, 128)
    Np = _round_up(N, 128)

    # Batch tiling: multiple of 8 sublanes.  Padded rows (zeros) compute garbage that
    # is sliced off below -- correct, just wasted cycles, so keep the pad small.
    TB = min(_round_up(block_rows, 8), _round_up(B, 8))
    if B > 8 and _round_up(B, TB) // TB < 2:
        # Guarantee >= 2 batch tiles so the "parallel" axis can shard across both
        # TensorCores on v7x (no effect on single-TC v5e/v6e).
        TB = _round_up(pl.cdiv(B, 2), 8)
    Bp = _round_up(B, TB)
    n_bt = Bp // TB

    h0_p = jnp.pad(h0, ((0, Bp - B), (0, Cp - C)))
    w_in_p = jnp.pad(w_in, ((0, Cp - C), (0, Hp - H))).astype(compute_dtype)
    b_in_p = jnp.pad(b_in, ((0, Hp - H),)).reshape(1, Hp).astype(jnp.float32)
    if L > 0:
        w_blk_p = jnp.pad(w_blocks,
                          ((0, 0), (0, Hp - H), (0, Hp - H))).astype(compute_dtype)
        b_blk_p = jnp.pad(b_blocks,
                          ((0, 0), (0, Hp - H))).reshape(L, 1, Hp).astype(jnp.float32)
    else:
        w_blk_p = jnp.zeros((1, Hp, Hp), compute_dtype)
        b_blk_p = jnp.zeros((1, 1, Hp), jnp.float32)
    w_out_p = jnp.pad(w_out, ((0, Hp - H), (0, Np - N))).astype(compute_dtype)
    b_out_p = jnp.pad(b_out, ((0, Np - N),)).reshape(1, Np).astype(jnp.float32)

    # Explicit VMEM budget (v5e scoped default is only 16 MiB; v7x physical is 64 MiB):
    # double-buffered I/O tiles + (conservatively double-buffered) resident weights
    # + a few f32 (TB, Hp) live values for the unrolled layer loop.
    wbytes = compute_dtype.itemsize
    weight_bytes = 2 * wbytes * (Cp * Hp + L_stack * Hp * Hp + Hp * Np)
    bias_bytes = 2 * 4 * (Hp + L_stack * Hp + Np)
    io_bytes = 2 * 4 * (TB * Cp + TB * Np)
    live_bytes = 4 * 4 * TB * Hp
    vmem_limit = int(1.5 * (weight_bytes + bias_bytes + io_bytes + live_bytes))
    vmem_limit = max(min(vmem_limit, 64 << 20), 4 << 20)

    flops = 2 * Bp * (Cp * Hp + L * Hp * Hp + Hp * Np)
    bytes_accessed = (Bp * Cp * 4 + Bp * Np * 4
                      + weight_bytes // 2 + bias_bytes // 2)
    cost = pl.CostEstimate(flops=flops,
                           transcendentals=Bp * Hp * (L + 1),
                           bytes_accessed=bytes_accessed)

    kernel = functools.partial(_fused_mlp_kernel,
                               n_layers=L,
                               compute_dtype=compute_dtype,
                               approximate_gelu=approximate_gelu)

    out = pl.pallas_call(
        kernel,
        out_shape=jax.ShapeDtypeStruct((Bp, Np), jnp.float32),
        grid_spec=pltpu.PrefetchScalarGridSpec(
            num_scalar_prefetch=0,
            grid=(n_bt,),
            in_specs=[
                # x tile: one per grid step, pipelined across batch tiles.
                pl.BlockSpec((TB, Cp), lambda bt: (bt, 0)),
                # all weights/biases: full arrays, resident in VMEM (constant index).
                pl.BlockSpec((Cp, Hp), lambda bt: (0, 0)),
                pl.BlockSpec((1, Hp), lambda bt: (0, 0)),
                pl.BlockSpec((L_stack, Hp, Hp), lambda bt: (0, 0, 0)),
                pl.BlockSpec((L_stack, 1, Hp), lambda bt: (0, 0, 0)),
                pl.BlockSpec((Hp, Np), lambda bt: (0, 0)),
                pl.BlockSpec((1, Np), lambda bt: (0, 0)),
            ],
            out_specs=pl.BlockSpec((TB, Np), lambda bt: (bt, 0)),
        ),
        compiler_params=pltpu.CompilerParams(
            dimension_semantics=("parallel",),
            vmem_limit_bytes=vmem_limit),
        cost_estimate=cost,
    )(h0_p, w_in_p, b_in_p, w_blk_p, b_blk_p, w_out_p, b_out_p)

    return out[:B, :N]


# ------------------------- model: params + forward -------------------------- #

def _init_linear(key, fan_in, fan_out):
    """PyTorch nn.Linear default init: U(-1/sqrt(fan_in), 1/sqrt(fan_in)).
    Weight stored pre-transposed as (fan_in, fan_out)."""
    kw, kb = jax.random.split(key)
    bound = 1.0 / float(fan_in) ** 0.5
    w = jax.random.uniform(kw, (fan_in, fan_out), jnp.float32, -bound, bound)
    b = jax.random.uniform(kb, (fan_out,), jnp.float32, -bound, bound)
    return w, b


def init_mlp_nonorm(key, ndim, hidden_size, hidden_layers, emb_size):
    assert emb_size >= 4 and emb_size % 2 == 0, "emb_size must be even and >= 4"
    concat_size = ndim + emb_size
    keys = jax.random.split(key, hidden_layers + 2)
    w_in, b_in = _init_linear(keys[0], concat_size, hidden_size)
    if hidden_layers > 0:
        wbs = [_init_linear(keys[1 + l], hidden_size, hidden_size)
               for l in range(hidden_layers)]
        w_blocks = jnp.stack([w for w, _ in wbs], axis=0)      # (L, H, H)
        b_blocks = jnp.stack([b for _, b in wbs], axis=0)      # (L, H)
    else:
        w_blocks = jnp.zeros((0, hidden_size, hidden_size), jnp.float32)
        b_blocks = jnp.zeros((0, hidden_size), jnp.float32)
    w_out, b_out = _init_linear(keys[-1], hidden_size, ndim)
    return dict(w_in=w_in, b_in=b_in,
                w_blocks=w_blocks, b_blocks=b_blocks,
                w_out=w_out, b_out=b_out)


@functools.partial(jax.jit,
                   static_argnames=("block_rows", "compute_dtype",
                                    "approximate_gelu"))
def mlp_nonorm_forward(params, x, t, block_rows=1024, compute_dtype="bfloat16",
                       approximate_gelu=False):
    emb_size = int(params["w_in"].shape[0]) - int(x.shape[-1])
    # TODO(synk): sinusoidal embedding + concat stay as plain-JAX glue; folding the
    # 14-wide h0 construction into the kernel would save the padded-h0 HBM read but
    # only matters at very large batch.
    t_emb = sinusoidal_embedding(t, emb_size)
    h0 = jnp.concatenate([x, t_emb], axis=-1)
    return fused_mlp_nonorm(h0, params["w_in"], params["b_in"],
                            params["w_blocks"], params["b_blocks"],
                            params["w_out"], params["b_out"],
                            block_rows=block_rows,
                            compute_dtype=compute_dtype,
                            approximate_gelu=approximate_gelu)


def mlp_nonorm_reference(params, x, t):
    """Pure-JAX f32 reference for correctness checking."""
    emb_size = int(params["w_in"].shape[0]) - int(x.shape[-1])
    t_emb = sinusoidal_embedding(t, emb_size)
    h = jnp.concatenate([x, t_emb], axis=-1)
    h = _gelu_erf(h @ params["w_in"] + params["b_in"])
    for l in range(params["w_blocks"].shape[0]):
        h = h + _gelu_erf(h @ params["w_blocks"][l] + params["b_blocks"][l])
    return h @ params["w_out"] + params["b_out"]


# --------------------------------- main ------------------------------------ #

if __name__ == "__main__":
    # Small demo shapes.  batch=20 with the default tile size exercises the
    # "split into >= 2 batch tiles" path plus batch padding.
    batch, ndim, hidden_size, hidden_layers, emb_size = 20, 4, 128, 3, 10

    key = jax.random.PRNGKey(0)
    kparam, kx, kt = jax.random.split(key, 3)

    params = init_mlp_nonorm(kparam, ndim, hidden_size, hidden_layers, emb_size)
    x = jax.random.normal(kx, (batch, ndim), jnp.float32)
    t = jax.random.uniform(kt, (batch,), jnp.float32) * 1000.0

    ref = mlp_nonorm_reference(params, x, t)

    # Fast path: bf16 MXU operands, f32 accumulation / bias / residual / GELU.
    out_bf16 = mlp_nonorm_forward(params, x, t)
    jax.block_until_ready(out_bf16)
    assert out_bf16.shape == (batch, ndim) and out_bf16.dtype == jnp.float32
    assert jnp.allclose(out_bf16, ref, rtol=2e-2, atol=2e-2), \
        "bf16 kernel mismatch vs JAX reference"

    # Exact-parity path: f32 operands end-to-end.
    out_f32 = mlp_nonorm_forward(params, x, t, compute_dtype="float32")
    jax.block_until_ready(out_f32)
    assert jnp.allclose(out_f32, ref, rtol=1e-4, atol=1e-4), \
        "f32 kernel mismatch vs JAX reference"

    print("KERNEL_OK")
</pallas_src>

<mosaic_0001>
module attributes {stable_mosaic.version = 11 : i64} {
  func.func @_fused_mlp_kernel(%arg0: i32, %arg1: memref<16x128xf32, #tpu.memory_space<vmem>>, %arg2: memref<128x128xbf16, #tpu.memory_space<vmem>>, %arg3: memref<1x128xf32, #tpu.memory_space<vmem>>, %arg4: memref<3x128x128xbf16, #tpu.memory_space<vmem>>, %arg5: memref<3x1x128xf32, #tpu.memory_space<vmem>>, %arg6: memref<128x128xbf16, #tpu.memory_space<vmem>>, %arg7: memref<1x128xf32, #tpu.memory_space<vmem>>, %arg8: memref<16x128xf32, #tpu.memory_space<vmem>>) attributes {dimension_semantics = [#tpu.dimension_semantics<parallel>], iteration_bounds = array<i64: 2>, scalar_prefetch = 0 : i64, scratch_operands = 0 : i64, tpu.core_type = #tpu.core_type<tc>, window_params = [{transform_indices = @transform_0, window_bounds = array<i64: 16, 128>}, {pipeline_mode = #tpu.pipeline_mode<synchronous>, transform_indices = @transform_1, window_bounds = array<i64: 128, 128>}, {pipeline_mode = #tpu.pipeline_mode<synchronous>, transform_indices = @transform_2, window_bounds = array<i64: 1, 128>}, {pipeline_mode = #tpu.pipeline_mode<synchronous>, transform_indices = @transform_3, window_bounds = array<i64: 3, 128, 128>}, {pipeline_mode = #tpu.pipeline_mode<synchronous>, transform_indices = @transform_4, window_bounds = array<i64: 3, 1, 128>}, {pipeline_mode = #tpu.pipeline_mode<synchronous>, transform_indices = @transform_5, window_bounds = array<i64: 128, 128>}, {pipeline_mode = #tpu.pipeline_mode<synchronous>, transform_indices = @transform_6, window_bounds = array<i64: 1, 128>}, {transform_indices = @transform_7, window_bounds = array<i64: 16, 128>}]} {
    %c0 = arith.constant 0 : index
    %c0_0 = arith.constant 0 : index
    %0 = vector.load %arg1[%c0, %c0_0] : memref<16x128xf32, #tpu.memory_space<vmem>>, vector<16x128xf32>
    %1 = arith.truncf %0 : vector<16x128xf32> to vector<16x128xbf16>
    %c0_1 = arith.constant 0 : index
    %c0_2 = arith.constant 0 : index
    %2 = vector.load %arg2[%c0_1, %c0_2] : memref<128x128xbf16, #tpu.memory_space<vmem>>, vector<128x128xbf16>
    %cst = arith.constant dense<0.000000e+00> : vector<16x128xf32>
    %3 = tpu.matmul %1, %2, %cst {dimension_numbers = #tpu.dot_dimension_numbers<[1], [0], [0], [1], [0, 0, 1, 1], [], []>} : vector<16x128xbf16>, vector<128x128xbf16>, vector<16x128xf32> -> vector<16x128xf32>
    %c0_3 = arith.constant 0 : index
    %c0_4 = arith.constant 0 : index
    %4 = vector.load %arg3[%c0_3, %c0_4] : memref<1x128xf32, #tpu.memory_space<vmem>>, vector<1x128xf32>
    %5 = vector.broadcast %4 : vector<1x128xf32> to vector<16x128xf32>
    %6 = arith.addf %3, %5 : vector<16x128xf32>
    %cst_5 = arith.constant 5.000000e-01 : f32
    %7 = vector.broadcast %cst_5 : f32 to vector<16x128xf32>
    %8 = arith.mulf %7, %6 : vector<16x128xf32>
    %cst_6 = arith.constant 2.000000e+00 : f32
    %9 = math.sqrt %cst_6 : f32
    %cst_7 = arith.constant 1.000000e+00 : f32
    %10 = arith.divf %cst_7, %9 : f32
    %11 = vector.broadcast %10 : f32 to vector<16x128xf32>
    %12 = arith.mulf %6, %11 : vector<16x128xf32>
    %13 = math.erf %12 : vector<16x128xf32>
    %cst_8 = arith.constant 1.000000e+00 : f32
    %14 = vector.broadcast %cst_8 : f32 to vector<16x128xf32>
    %15 = arith.addf %14, %13 : vector<16x128xf32>
    %16 = arith.mulf %8, %15 : vector<16x128xf32>
    %17 = arith.truncf %16 : vector<16x128xf32> to vector<16x128xbf16>
    %c0_9 = arith.constant 0 : index
    %c0_10 = arith.constant 0 : index
    %c0_11 = arith.constant 0 : index
    %18 = vector.load %arg4[%c0_9, %c0_10, %c0_11] : memref<3x128x128xbf16, #tpu.memory_space<vmem>>, vector<1x128x128xbf16>
    %19 = vector.shape_cast %18 : vector<1x128x128xbf16> to vector<128x128xbf16>
    %cst_12 = arith.constant dense<0.000000e+00> : vector<16x128xf32>
    %20 = tpu.matmul %17, %19, %cst_12 {dimension_numbers = #tpu.dot_dimension_numbers<[1], [0], [0], [1], [0, 0, 1, 1], [], []>} : vector<16x128xbf16>, vector<128x128xbf16>, vector<16x128xf32> -> vector<16x128xf32>
    %c0_13 = arith.constant 0 : index
    %c0_14 = arith.constant 0 : index
    %c0_15 = arith.constant 0 : index
    %21 = vector.load %arg5[%c0_13, %c0_14, %c0_15] : memref<3x1x128xf32, #tpu.memory_space<vmem>>, vector<1x1x128xf32>
    %22 = vector.shape_cast %21 : vector<1x1x128xf32> to vector<1x128xf32>
    %23 = vector.broadcast %22 : vector<1x128xf32> to vector<16x128xf32>
    %24 = arith.addf %20, %23 : vector<16x128xf32>
    %cst_16 = arith.constant 5.000000e-01 : f32
    %25 = vector.broadcast %cst_16 : f32 to vector<16x128xf32>
    %26 = arith.mulf %25, %24 : vector<16x128xf32>
    %cst_17 = arith.constant 2.000000e+00 : f32
    %27 = math.sqrt %cst_17 : f32
    %cst_18 = arith.constant 1.000000e+00 : f32
    %28 = arith.divf %cst_18, %27 : f32
    %29 = vector.broadcast %28 : f32 to vector<16x128xf32>
    %30 = arith.mulf %24, %29 : vector<16x128xf32>
    %31 = math.erf %30 : vector<16x128xf32>
    %cst_19 = arith.constant 1.000000e+00 : f32
    %32 = vector.broadcast %cst_19 : f32 to vector<16x128xf32>
    %33 = arith.addf %32, %31 : vector<16x128xf32>
    %34 = arith.mulf %26, %33 : vector<16x128xf32>
    %35 = arith.addf %16, %34 : vector<16x128xf32>
    %36 = arith.truncf %35 : vector<16x128xf32> to vector<16x128xbf16>
    %c1 = arith.constant 1 : index
    %c0_20 = arith.constant 0 : index
    %c0_21 = arith.constant 0 : index
    %37 = vector.load %arg4[%c1, %c0_20, %c0_21] : memref<3x128x128xbf16, #tpu.memory_space<vmem>>, vector<1x128x128xbf16>
    %38 = vector.shape_cast %37 : vector<1x128x128xbf16> to vector<128x128xbf16>
    %cst_22 = arith.constant dense<0.000000e+00> : vector<16x128xf32>
    %39 = tpu.matmul %36, %38, %cst_22 {dimension_numbers = #tpu.dot_dimension_numbers<[1], [0], [0], [1], [0, 0, 1, 1], [], []>} : vector<16x128xbf16>, vector<128x128xbf16>, vector<16x128xf32> -> vector<16x128xf32>
    %c1_23 = arith.constant 1 : index
    %c0_24 = arith.constant 0 : index
    %c0_25 = arith.constant 0 : index
    %40 = vector.load %arg5[%c1_23, %c0_24, %c0_25] : memref<3x1x128xf32, #tpu.memory_space<vmem>>, vector<1x1x128xf32>
    %41 = vector.shape_cast %40 : vector<1x1x128xf32> to vector<1x128xf32>
    %42 = vector.broadcast %41 : vector<1x128xf32> to vector<16x128xf32>
    %43 = arith.addf %39, %42 : vector<16x128xf32>
    %cst_26 = arith.constant 5.000000e-01 : f32
    %44 = vector.broadcast %cst_26 : f32 to vector<16x128xf32>
    %45 = arith.mulf %44, %43 : vector<16x128xf32>
    %cst_27 = arith.constant 2.000000e+00 : f32
    %46 = math.sqrt %cst_27 : f32
    %cst_28 = arith.constant 1.000000e+00 : f32
    %47 = arith.divf %cst_28, %46 : f32
    %48 = vector.broadcast %47 : f32 to vector<16x128xf32>
    %49 = arith.mulf %43, %48 : vector<16x128xf32>
    %50 = math.erf %49 : vector<16x128xf32>
    %cst_29 = arith.constant 1.000000e+00 : f32
    %51 = vector.broadcast %cst_29 : f32 to vector<16x128xf32>
    %52 = arith.addf %51, %50 : vector<16x128xf32>
    %53 = arith.mulf %45, %52 : vector<16x128xf32>
    %54 = arith.addf %35, %53 : vector<16x128xf32>
    %55 = arith.truncf %54 : vector<16x128xf32> to vector<16x128xbf16>
    %c2 = arith.constant 2 : index
    %c0_30 = arith.constant 0 : index
    %c0_31 = arith.constant 0 : index
    %56 = vector.load %arg4[%c2, %c0_30, %c0_31] : memref<3x128x128xbf16, #tpu.memory_space<vmem>>, vector<1x128x128xbf16>
    %57 = vector.shape_cast %56 : vector<1x128x128xbf16> to vector<128x128xbf16>
    %cst_32 = arith.constant dense<0.000000e+00> : vector<16x128xf32>
    %58 = tpu.matmul %55, %57, %cst_32 {dimension_numbers = #tpu.dot_dimension_numbers<[1], [0], [0], [1], [0, 0, 1, 1], [], []>} : vector<16x128xbf16>, vector<128x128xbf16>, vector<16x128xf32> -> vector<16x128xf32>
    %c2_33 = arith.constant 2 : index
    %c0_34 = arith.constant 0 : index
    %c0_35 = arith.constant 0 : index
    %59 = vector.load %arg5[%c2_33, %c0_34, %c0_35] : memref<3x1x128xf32, #tpu.memory_space<vmem>>, vector<1x1x128xf32>
    %60 = vector.shape_cast %59 : vector<1x1x128xf32> to vector<1x128xf32>
    %61 = vector.broadcast %60 : vector<1x128xf32> to vector<16x128xf32>
    %62 = arith.addf %58, %61 : vector<16x128xf32>
    %cst_36 = arith.constant 5.000000e-01 : f32
    %63 = vector.broadcast %cst_36 : f32 to vector<16x128xf32>
    %64 = arith.mulf %63, %62 : vector<16x128xf32>
    %cst_37 = arith.constant 2.000000e+00 : f32
    %65 = math.sqrt %cst_37 : f32
    %cst_38 = arith.constant 1.000000e+00 : f32
    %66 = arith.divf %cst_38, %65 : f32
    %67 = vector.broadcast %66 : f32 to vector<16x128xf32>
    %68 = arith.mulf %62, %67 : vector<16x128xf32>
    %69 = math.erf %68 : vector<16x128xf32>
    %cst_39 = arith.constant 1.000000e+00 : f32
    %70 = vector.broadcast %cst_39 : f32 to vector<16x128xf32>
    %71 = arith.addf %70, %69 : vector<16x128xf32>
    %72 = arith.mulf %64, %71 : vector<16x128xf32>
    %73 = arith.addf %54, %72 : vector<16x128xf32>
    %74 = arith.truncf %73 : vector<16x128xf32> to vector<16x128xbf16>
    %c0_40 = arith.constant 0 : index
    %c0_41 = arith.constant 0 : index
    %75 = vector.load %arg6[%c0_40, %c0_41] : memref<128x128xbf16, #tpu.memory_space<vmem>>, vector<128x128xbf16>
    %cst_42 = arith.constant dense<0.000000e+00> : vector<16x128xf32>
    %76 = tpu.matmul %74, %75, %cst_42 {dimension_numbers = #tpu.dot_dimension_numbers<[1], [0], [0], [1], [0, 0, 1, 1], [], []>} : vector<16x128xbf16>, vector<128x128xbf16>, vector<16x128xf32> -> vector<16x128xf32>
    %c0_43 = arith.constant 0 : index
    %c0_44 = arith.constant 0 : index
    %77 = vector.load %arg7[%c0_43, %c0_44] : memref<1x128xf32, #tpu.memory_space<vmem>>, vector<1x128xf32>
    %78 = vector.broadcast %77 : vector<1x128xf32> to vector<16x128xf32>
    %79 = arith.addf %76, %78 : vector<16x128xf32>
    %c0_45 = arith.constant 0 : index
    %c0_46 = arith.constant 0 : index
    %80 = vector.load %arg8[%c0_45, %c0_46] : memref<16x128xf32, #tpu.memory_space<vmem>>, vector<16x128xf32>
    tpu.vector_store %arg8[%c0_45, %c0_46], %79 {strides = array<i32>} : memref<16x128xf32, #tpu.memory_space<vmem>>, vector<16x128xf32>,
    return
  }
  func.func @transform_0(%arg0: i32) -> (i32, i32) {
    %c0_i32 = arith.constant 0 : i32
    %c0_i32_0 = arith.constant 0 : i32
    return %arg0, %c0_i32 : i32, i32
  }
  func.func @transform_1(%arg0: i32) -> (i32, i32) {
    %c0_i32 = arith.constant 0 : i32
    %c0_i32_0 = arith.constant 0 : i32
    %c0_i32_1 = arith.constant 0 : i32
    return %c0_i32, %c0_i32_0 : i32, i32
  }
  func.func @transform_2(%arg0: i32) -> (i32, i32) {
    %c0_i32 = arith.constant 0 : i32
    %c0_i32_0 = arith.constant 0 : i32
    %c0_i32_1 = arith.constant 0 : i32
    return %c0_i32, %c0_i32_0 : i32, i32
  }
  func.func @transform_3(%arg0: i32) -> (i32, i32, i32) {
    %c0_i32 = arith.constant 0 : i32
    %c0_i32_0 = arith.constant 0 : i32
    %c0_i32_1 = arith.constant 0 : i32
    %c0_i32_2 = arith.constant 0 : i32
    return %c0_i32, %c0_i32_0, %c0_i32_1 : i32, i32, i32
  }
  func.func @transform_4(%arg0: i32) -> (i32, i32, i32) {
    %c0_i32 = arith.constant 0 : i32
    %c0_i32_0 = arith.constant 0 : i32
    %c0_i32_1 = arith.constant 0 : i32
    %c0_i32_2 = arith.constant 0 : i32
    return %c0_i32, %c0_i32_0, %c0_i32_1 : i32, i32, i32
  }
  func.func @transform_5(%arg0: i32) -> (i32, i32) {
    %c0_i32 = arith.constant 0 : i32
    %c0_i32_0 = arith.constant 0 : i32
    %c0_i32_1 = arith.constant 0 : i32
    return %c0_i32, %c0_i32_0 : i32, i32
  }
  func.func @transform_6(%arg0: i32) -> (i32, i32) {
    %c0_i32 = arith.constant 0 : i32
    %c0_i32_0 = arith.constant 0 : i32
    %c0_i32_1 = arith.constant 0 : i32
    return %c0_i32, %c0_i32_0 : i32, i32
  }
  func.func @transform_7(%arg0: i32) -> (i32, i32) {
    %c0_i32 = arith.constant 0 : i32
    %c0_i32_0 = arith.constant 0 : i32
    return %arg0, %c0_i32 : i32, i32
  }
}

</mosaic_0001>

<bundles_post_ra>
// kernel: mlp_nonorm_forward.1
= control target key start
LH: loop header
LB: loop body
LE: loop exit
PB: predicated region body
PF: predicated region fallthrough
CT: control target
= control target key end

     0   :  { %s1309_s24 = smov 0   ;;  %s1518_s0 = inlined_call_operand.vmem [shape: f32[32,128], index: 0, kind: input, shape index: {}]   ;;  %s1519_s1 = inlined_call_operand.vmem [shape: bf16[128,128], index: 1, kind: input, shape index: {}]   ;;  %s1520_s2 = inlined_call_operand.vmem [shape: f32[1,128], index: 2, kind: input, shape index: {}]   ;;  %s1521_s3 = inlined_call_operand.vmem [shape: bf16[3,128,128], index: 3, kind: input, shape index: {}]   ;;  %s1522_s4 = inlined_call_operand.vmem [shape: f32[3,1,128], index: 4, kind: input, shape index: {}]   ;;  %s1523_s5 = inlined_call_operand.vmem [shape: bf16[128,128], index: 5, kind: input, shape index: {}]   ;;  %s1524_s6 = inlined_call_operand.vmem [shape: f32[1,128], index: 6, kind: input, shape index: {}]   ;;  %s1525_s7 = inlined_call_operand.vmem [shape: f32[32,128], index: 7, kind: output, shape index: {}]  }
   0x1 LB: > { %s958_s25 = sadd.s32 4294967295, %s1265_s24   ;;  %p962_p0 = scmp.ge.s32.totalorder %s1265_s24, 1  ;;  %s1265_s24 = sphi %s1309_s24, %s17_s24  }
   0x2   : > { %p238_p1 = scmp.lt.s32.totalorder %s1265_s24, 3 }
   0x4   : > { %p239_p2 = pnand %p962_p0, %p238_p1 }
   0x5   : > { %v1203_v0 = vld [vmem:[%s1519_s1] sm:$0xff] (!%p239_p2)   ;;  %v1267_v1 = vmov (!%p239_p2), 0.0   ;;  %v1204_v2 = vld [vmem:[%s1519_s1 + $0x8] sm:$0xff] (!%p239_p2)   ;;  %vm1268_vm0 = vmmov (!%p239_p2), 0   ;;  %s963_s30 = sshll.u32 (!%p239_p2), %s958_s25, 1  ;;  %v1205_v3 = vld [vmem:[%s1519_s1 + $0x10] sm:$0xff] (!%p239_p2)  }
   0x6   : > { %242 = sbr.rel (%p239_p2) target bundleno = 1201 (0x4b1), region = 48  ;;  %1093 = vmatprep.subr.bf16.mxu0 (!%p239_p2), %v1267_v1  ;;  %1113 = vmatprep.subr.bf16.mxu1 (!%p239_p2), %v1267_v1  ;;  %p271_p3 = scmp.lt.s32.totalorder (!%p239_p2), %s963_s30, 3  ;;  %v1211_v4 = vld [vmem:[%s1521_s3] sm:$0xff] (!%p239_p2)   ;;  %v1206_v5 = vld [vmem:[%s1519_s1 + $0x18] sm:$0xff] (!%p239_p2)   ;;  %v1212_v6 = vld [vmem:[%s1521_s3 + $0x8] sm:$0xff] (!%p239_p2)  }
   0x7   : > { %1094 = vmatpush3.bf16.msra.mxu0 (!%p239_p2), %v1203_v0  ;;  %1109 = vmatprep.mubr.msk.bf16.mxu0 (!%p239_p2), %vm1268_vm0, %v1267_v1  ;;  %v1207_v7 = vld [vmem:[%s1519_s1 + $0x20] sm:$0xff] (!%p239_p2)   ;;  %v1208_v8 = vld [vmem:[%s1519_s1 + $0x28] sm:$0xff] (!%p239_p2)   ;;  %v1209_v9 = vld [vmem:[%s1519_s1 + $0x30] sm:$0xff] (!%p239_p2)  }
   0x8   : > { %1095 = vmatprep.subr.bf16.mxu0 (!%p239_p2), %v1267_v1  ;;  %1129 = vmatprep.mubr.msk.bf16.mxu1 (!%p239_p2), %vm1268_vm0, %v1267_v1  ;;  %v1210_v10 = vld [vmem:[%s1519_s1 + $0x38] sm:$0xff] (!%p239_p2)   ;;  %v1213_v14 = vld [vmem:[%s1521_s3 + $0x10] sm:$0xff] (!%p239_p2)   ;;  %v1215_v16 = vld [vmem:[%s1521_s3 + $0x20] sm:$0xff] (!%p239_p2)  }
   0x9   : > { %1114 = vmatpush3.bf16.msra.mxu1 (!%p239_p2), %v1211_v4  ;;  %v1214_v15 = vld [vmem:[%s1521_s3 + $0x18] sm:$0xff] (!%p239_p2)   ;;  %v1216_v17 = vld [vmem:[%s1521_s3 + $0x28] sm:$0xff] (!%p239_p2)   ;;  %v1217_v18 = vld [vmem:[%s1521_s3 + $0x30] sm:$0xff] (!%p239_p2)  }
   0xa   : > { %1115 = vmatprep.subr.bf16.mxu1 (!%p239_p2), %v1267_v1  ;;  %v1218_v19 = vld [vmem:[%s1521_s3 + $0x38] sm:$0xff] (!%p239_p2)   ;;  %v1219_v20 = vld [vmem:[%s1521_s3 + $0x40] sm:$0xff] (!%p239_p2)   ;;  %v1220_v21 = vld [vmem:[%s1521_s3 + $0x48] sm:$0xff] (!%p239_p2)  }
   0xb   : > { %1096 = vmatpush3.bf16.msra.mxu0 (!%p239_p2), %v1204_v2  ;;  %v967_v22 = vld [vmem:[%s1520_s2] ss:$0 sm:$0xff] (!%p239_p2)  ;;  %v1221_v40 = vld [vmem:[%s1521_s3 + $0x50] sm:$0xff] (!%p239_p2)   ;;  %v1222_v41 = vld [vmem:[%s1521_s3 + $0x58] sm:$0xff] (!%p239_p2)  }
   0xc   : > { %1097 = vmatprep.subr.bf16.mxu0 (!%p239_p2), %v1267_v1  ;;  %v1223_v42 = vld [vmem:[%s1521_s3 + $0x60] sm:$0xff] (!%p239_p2)   ;;  %v1224_v43 = vld [vmem:[%s1521_s3 + $0x68] sm:$0xff] (!%p239_p2)   ;;  %v1225_v44 = vld [vmem:[%s1521_s3 + $0x70] sm:$0xff] (!%p239_p2)  }
   0xd   : > { %s1527_s30 = smov (!%p271_p3, %s963_s30), 3  ;;  %1116 = vmatpush3.bf16.msra.mxu1 %v1212_v6  ;;  %v1226_v45 = vld [vmem:[%s1521_s3 + $0x78] sm:$0xff]   ;;  %v1227_v46 = vld [vmem:[%s1521_s3 + $0x80] sm:$0xff]   ;;  %v1228_v47 = vld [vmem:[%s1521_s3 + $0x88] sm:$0xff]  }
   0xe   : > { %s964_s14 = sshll.u32 %s1527_s30, 3  ;;  %1117 = vmatprep.subr.bf16.mxu1 %v1267_v1  ;;  %v976_v48 = vld [vmem:[%s1522_s4] ss:$0 sm:$0xff]  ;;  %v1230_v6 = vld [vmem:[%s1521_s3 + $0x98] sm:$0xff]  }
   0xf   : > { %1098 = vmatpush3.bf16.msra.mxu0 %v1205_v3  ;;  %s274_s26 = scalar_lea.vmem %s1518_s0, %s964_s14  ;;  %s280_s20 = scalar_lea.vmem %s1525_s7, %s964_s14 }
  0x10   : > { %1099 = vmatprep.subr.bf16.mxu0 %v1267_v1  ;;  %v283_v11 = vld [vmem:[%s274_s26] sm:$0xff]  ;;  %v284_v12 = vld [vmem:[%s274_s26 + $0x8] sm:$0xff] }
  0x11   : > { %v285_v13 = vpack.c.bf16 %v284_v12, %v283_v11  ;;  %1118 = vmatpush3.bf16.msra.mxu1 %v1213_v14  ;;  %v1235_v11 = vld [vmem:[%s1523_s5] sm:$0xff]   ;;  %v1236_v12 = vld [vmem:[%s1523_s5 + $0x8] sm:$0xff]  }
  0x12   : > { %1119 = vmatprep.subr.bf16.mxu1 %v1267_v1 }
  0x13   : > { %1100 = vmatpush3.bf16.msra.mxu0 %v1206_v5  ;;  %v1229_v5 = vld [vmem:[%s1521_s3 + $0x90] sm:$0xff]  }
  0x14   : > { %1101 = vmatprep.subr.bf16.mxu0 %v1267_v1 }
  0x15   : > { %1120 = vmatpush3.bf16.msra.mxu1 %v1214_v15 }
  0x16   : > { %1121 = vmatprep.subr.bf16.mxu1 %v1267_v1 }
  0x17   : > { %1102 = vmatpush3.bf16.msra.mxu0 %v1207_v7  ;;  %v1231_v7 = vld [vmem:[%s1521_s3 + $0xa0] sm:$0xff]  }
  0x18   : > { %1103 = vmatprep.subr.bf16.mxu0 %v1267_v1 }
  0x19   : > { %1122 = vmatpush3.bf16.msra.mxu1 %v1215_v16 }
  0x1a   : > { %1123 = vmatprep.subr.bf16.mxu1 %v1267_v1 }
  0x1b   : > { %1104 = vmatpush3.bf16.msra.mxu0 %v1208_v8  ;;  %v1232_v8 = vld [vmem:[%s1521_s3 + $0xa8] sm:$0xff]  }
  0x1c   : > { %1105 = vmatprep.subr.bf16.mxu0 %v1267_v1 }
  0x1d   : > { %1124 = vmatpush3.bf16.msra.mxu1 %v1216_v17 }
  0x1e   : > { %1125 = vmatprep.subr.bf16.mxu1 %v1267_v1 }
  0x1f   : > { %1106 = vmatpush3.bf16.msra.mxu0 %v1209_v9  ;;  %v1233_v9 = vld [vmem:[%s1521_s3 + $0xb0] sm:$0xff]  }
  0x20   : > { %1107 = vmatprep.subr.bf16.mxu0 %v1267_v1 }
  0x21   : > { %1126 = vmatpush3.bf16.msra.mxu1 %v1217_v18 }
  0x22   : > { %1127 = vmatprep.subr.bf16.mxu1 %v1267_v1 }
  0x23   : > { %1108 = vmatpush3.bf16.msra.mxu0 %v1210_v10  ;;  %v1234_v10 = vld [vmem:[%s1521_s3 + $0xb8] sm:$0xff]  }
  0x24   : > { %1133 = vmatprep.subr.bf16.mxu0 %v1267_v1 }
  0x25   : > { %1128 = vmatpush3.bf16.msra.mxu1 %v1218_v19 }
  0x26   : > { %1110 = vmatmul.mubr.bf16.vlgmr.msra.gmra.mrb[0].mxu0 %v285_v13  ;;  %1153 = vmatprep.subr.bf16.mxu1 %v1267_v1  ;;  %v1002_v13 = vld [vmem:[%s1522_s4 + $0x1] ss:$0 sm:$0xff] }
  0x27   : > { %1149 = vmatprep.mubr.msk.bf16.mxu0 %vm1268_vm0, %v1267_v1  ;;  %1134 = vmatpush3.bf16.msra.mxu0 %v1219_v20 }
  0x28   : > { %1135 = vmatprep.subr.bf16.mxu0 %v1267_v1 }
  0x2b   : > { %1136 = vmatpush3.bf16.msra.mxu0 %v1220_v21 }
  0x2c   : > { %1137 = vmatprep.subr.bf16.mxu0 %v1267_v1 }
  0x2f   : > { %1138 = vmatpush3.bf16.msra.mxu0 %v1221_v40 }
  0x30   : > { %1139 = vmatprep.subr.bf16.mxu0 %v1267_v1 }
  0x33   : > { %1140 = vmatpush3.bf16.msra.mxu0 %v1222_v41 }
  0x34   : > { %1141 = vmatprep.subr.bf16.mxu0 %v1267_v1 }
  0x37   : > { %1142 = vmatpush3.bf16.msra.mxu0 %v1223_v42 }
  0x38   : > { %1143 = vmatprep.subr.bf16.mxu0 %v1267_v1 }
  0x3b   : > { %1144 = vmatpush3.bf16.msra.mxu0 %v1224_v43 }
  0x3c   : > { %1145 = vmatprep.subr.bf16.mxu0 %v1267_v1 }
  0x3f   : > { %1146 = vmatpush3.bf16.msra.mxu0 %v1225_v44 }
  0x40   : > { %1147 = vmatprep.subr.bf16.mxu0 %v1267_v1 }
  0x43   : > { %1148 = vmatpush3.bf16.msra.mxu0 %v1226_v45 }
  0x44   : > { %1173 = vmatprep.subr.bf16.mxu0 %v1267_v1 }
  0xf9   : > { %v391_v23 = vpop.f32.mrb[0].mxu0 }
  0xfa   : > { %v392_v24 = vadd.f32 %v967_v22, %v391_v23  ;;  %v1111_v25 = vpop.f32.mrb[1].mxu0 }
  0xfb   : > { %v394_v26 = vpop.f32.mrb[2].mxu0 }
  0xfc   : > { %v400_v27 = vmul.f32 0.70710677, %v392_v24  ;;  %v395_v28 = vadd.f32 %v967_v22, %v394_v26  ;;  %v1112_v29 = vpop.f32.mrb[3].mxu0  ;;  %v398_v34 = vmul.f32 0.5, %v392_v24 }
  0xfe   : > { %1243 = verf.f32 %v400_v27  ;;  %v401_v30 = vmul.f32 0.70710677, %v395_v28  ;;  %v399_v35 = vmul.f32 0.5, %v395_v28 }
 0x100   : > { %1245 = verf.f32 %v401_v30 }
 0x108   : > { %v1244_v31 = vpop.eup %1243 }
 0x109   : > { %v404_v32 = vadd.f32 1.0, %v1244_v31 }
 0x10a   : > { %v1246_v33 = vpop.eup %1245 }
 0x10b   : > { %v405_v36 = vadd.f32 1.0, %v1246_v33  ;;  %v406_v37 = vmul.f32 %v404_v32, %v398_v34  ;;  %v1237_v33 = vld [vmem:[%s1523_s5 + $0x10] sm:$0xff]   ;;  %v1238_v34 = vld [vmem:[%s1523_s5 + $0x18] sm:$0xff]  }
 0x10d   : > { %v407_v38 = vmul.f32 %v405_v36, %v399_v35  ;;  %v1239_v35 = vld [vmem:[%s1523_s5 + $0x20] sm:$0xff]   ;;  %v1240_v36 = vld [vmem:[%s1523_s5 + $0x28] sm:$0xff]  }
 0x10f   : > { %v408_v39 = vpack.c.bf16 %v407_v38, %v406_v37 }
 0x111   : > { %1130 = vmatmul.mubr.bf16.vlgmr.msra.gmra.mrb[0].mxu1 %v408_v39  ;;  %v1028_v39 = vld [vmem:[%s1522_s4 + $0x2] ss:$0 sm:$0xff] }
 0x112   : > { %1169 = vmatprep.mubr.msk.bf16.mxu1 %vm1268_vm0, %v1267_v1  ;;  %1154 = vmatpush3.bf16.msra.mxu1 %v1227_v46 }
 0x113   : > { %1155 = vmatprep.subr.bf16.mxu1 %v1267_v1 }
 0x116   : > { %1156 = vmatpush3.bf16.msra.mxu1 %v1228_v47 }
 0x117   : > { %1157 = vmatprep.subr.bf16.mxu1 %v1267_v1 }
 0x11a   : > { %1158 = vmatpush3.bf16.msra.mxu1 %v1229_v5 }
 0x11b   : > { %1159 = vmatprep.subr.bf16.mxu1 %v1267_v1 }
 0x11e   : > { %1160 = vmatpush3.bf16.msra.mxu1 %v1230_v6 }
 0x11f   : > { %1161 = vmatprep.subr.bf16.mxu1 %v1267_v1 }
 0x122   : > { %1162 = vmatpush3.bf16.msra.mxu1 %v1231_v7 }
 0x123   : > { %1163 = vmatprep.subr.bf16.mxu1 %v1267_v1 }
 0x126   : > { %1164 = vmatpush3.bf16.msra.mxu1 %v1232_v8 }
 0x127   : > { %1165 = vmatprep.subr.bf16.mxu1 %v1267_v1 }
 0x12a   : > { %1166 = vmatpush3.bf16.msra.mxu1 %v1233_v9 }
 0x12b   : > { %1167 = vmatprep.subr.bf16.mxu1 %v1267_v1 }
 0x12e   : > { %1168 = vmatpush3.bf16.msra.mxu1 %v1234_v10 }
 0x1e4   : > { %v514_v49 = vpop.f32.mrb[0].mxu1 }
 0x1e5   : > { %v515_v50 = vadd.f32 %v976_v48, %v514_v49  ;;  %v1131_v51 = vpop.f32.mrb[1].mxu1 }
 0x1e6   : > { %v517_v52 = vpop.f32.mrb[2].mxu1 }
 0x1e7   : > { %v523_v53 = vmul.f32 0.70710677, %v515_v50  ;;  %v518_v54 = vadd.f32 %v976_v48, %v517_v52  ;;  %v1132_v55 = vpop.f32.mrb[3].mxu1  ;;  %v521_v58 = vmul.f32 0.5, %v515_v50 }
 0x1e9   : > { %1247 = verf.f32 %v523_v53  ;;  %v524_v56 = vmul.f32 0.70710677, %v518_v54  ;;  %v522_v62 = vmul.f32 0.5, %v518_v54 }
 0x1eb   : > { %1249 = verf.f32 %v524_v56 }
 0x1f3   : > { %v1248_v57 = vpop.eup %1247 }
 0x1f4   : > { %v527_v59 = vadd.f32 1.0, %v1248_v57 }
 0x1f5   : > { %v1250_v60 = vpop.eup %1249 }
 0x1f6   : > { %v529_v61 = vmul.f32 %v527_v59, %v521_v58  ;;  %v528_v63 = vadd.f32 1.0, %v1250_v60  ;;  %v1037_v58 = vld [vmem:[%s1524_s6] ss:$0 sm:$0xff] }
 0x1f8   : > { %v530_v0 = vmul.f32 %v528_v63, %v522_v62  ;;  %v531_v2 = vadd.f32 %v529_v61, %v406_v37  ;;  %v1241_v37 = vld [vmem:[%s1523_s5 + $0x30] sm:$0xff]  }
 0x1fa   : > { %v532_v3 = vadd.f32 %v530_v0, %v407_v38  ;;  %v1242_v38 = vld [vmem:[%s1523_s5 + $0x38] sm:$0xff]  }
 0x1fc   : > { %v533_v4 = vpack.c.bf16 %v532_v3, %v531_v2 }
 0x1fe   : > { %1150 = vmatmul.mubr.bf16.vlgmr.msra.gmra.mrb[4].mxu0 %v533_v4 }
 0x1ff   : > { %1189 = vmatprep.mubr.msk.bf16.mxu0 %vm1268_vm0, %v1267_v1  ;;  %1174 = vmatpush3.bf16.msra.mxu0 %v1235_v11 }
 0x200   : > { %1175 = vmatprep.subr.bf16.mxu0 %v1267_v1 }
 0x203   : > { %1176 = vmatpush3.bf16.msra.mxu0 %v1236_v12 }
 0x204   : > { %1177 = vmatprep.subr.bf16.mxu0 %v1267_v1 }
 0x207   : > { %1178 = vmatpush3.bf16.msra.mxu0 %v1237_v33 }
 0x208   : > { %1179 = vmatprep.subr.bf16.mxu0 %v1267_v1 }
 0x20b   : > { %1180 = vmatpush3.bf16.msra.mxu0 %v1238_v34 }
 0x20c   : > { %1181 = vmatprep.subr.bf16.mxu0 %v1267_v1 }
 0x20f   : > { %1182 = vmatpush3.bf16.msra.mxu0 %v1239_v35 }
 0x210   : > { %1183 = vmatprep.subr.bf16.mxu0 %v1267_v1 }
 0x213   : > { %1184 = vmatpush3.bf16.msra.mxu0 %v1240_v36 }
 0x214   : > { %1185 = vmatprep.subr.bf16.mxu0 %v1267_v1 }
 0x217   : > { %1186 = vmatpush3.bf16.msra.mxu0 %v1241_v37 }
 0x218   : > { %1187 = vmatprep.subr.bf16.mxu0 %v1267_v1 }
 0x21b   : > { %1188 = vmatpush3.bf16.msra.mxu0 %v1242_v38 }
 0x2d1   : > { %v641_v14 = vpop.f32.mrb[4].mxu0 }
 0x2d2   : > { %v642_v15 = vadd.f32 %v1002_v13, %v641_v14  ;;  %v1151_v16 = vpop.f32.mrb[5].mxu0 }
 0x2d3   : > { %v644_v17 = vpop.f32.mrb[6].mxu0 }
 0x2d4   : > { %v650_v18 = vmul.f32 0.70710677, %v642_v15  ;;  %v645_v19 = vadd.f32 %v1002_v13, %v644_v17  ;;  %v1152_v20 = vpop.f32.mrb[7].mxu0  ;;  %v648_v23 = vmul.f32 0.5, %v642_v15 }
 0x2d6   : > { %1251 = verf.f32 %v650_v18  ;;  %v651_v21 = vmul.f32 0.70710677, %v645_v19  ;;  %v649_v27 = vmul.f32 0.5, %v645_v19 }
 0x2d8   : > { %1253 = verf.f32 %v651_v21 }
 0x2e0   : > { %v1252_v22 = vpop.eup %1251 }
 0x2e1   : > { %v654_v24 = vadd.f32 1.0, %v1252_v22 }
 0x2e2   : > { %v1254_v25 = vpop.eup %1253 }
 0x2e3   : > { %v656_v26 = vmul.f32 %v654_v24, %v648_v23  ;;  %v655_v28 = vadd.f32 1.0, %v1254_v25 }
 0x2e5   : > { %v657_v29 = vmul.f32 %v655_v28, %v649_v27  ;;  %v658_v30 = vadd.f32 %v656_v26, %v531_v2 }
 0x2e7   : > { %v659_v31 = vadd.f32 %v657_v29, %v532_v3 }
 0x2e9   : > { %v660_v32 = vpack.c.bf16 %v659_v31, %v658_v30 }
 0x2eb   : > { %1170 = vmatmul.mubr.bf16.vlgmr.msra.gmra.mrb[4].mxu1 %v660_v32 }
 0x3be   : > { %v768_v40 = vpop.f32.mrb[4].mxu1 }
 0x3bf   : > { %v769_v41 = vadd.f32 %v1028_v39, %v768_v40  ;;  %v1171_v42 = vpop.f32.mrb[5].mxu1 }
 0x3c0   : > { %v771_v43 = vpop.f32.mrb[6].mxu1 }
 0x3c1   : > { %v777_v44 = vmul.f32 0.70710677, %v769_v41  ;;  %v772_v45 = vadd.f32 %v1028_v39, %v771_v43  ;;  %v1172_v46 = vpop.f32.mrb[7].mxu1  ;;  %v775_v48 = vmul.f32 0.5, %v769_v41 }
 0x3c3   : > { %1255 = verf.f32 %v777_v44  ;;  %v778_v47 = vmul.f32 0.70710677, %v772_v45  ;;  %v776_v52 = vmul.f32 0.5, %v772_v45 }
 0x3c5   : > { %1257 = verf.f32 %v778_v47 }
 0x3cd   : > { %v1256_v1 = vpop.eup %1255 }
 0x3ce   : > { %v781_v49 = vadd.f32 1.0, %v1256_v1 }
 0x3cf   : > { %v1258_v50 = vpop.eup %1257 }
 0x3d0   : > { %v783_v51 = vmul.f32 %v781_v49, %v775_v48  ;;  %v782_v53 = vadd.f32 1.0, %v1258_v50 }
 0x3d2   : > { %v784_v54 = vmul.f32 %v782_v53, %v776_v52  ;;  %v785_v55 = vadd.f32 %v783_v51, %v658_v30 }
 0x3d4   : > { %v786_v56 = vadd.f32 %v784_v54, %v659_v31 }
 0x3d6   : > { %v787_v57 = vpack.c.bf16 %v786_v56, %v785_v55 }
 0x3d8   : > { %1190 = vmatmul.mubr.bf16.vlgmr.msra.gmra.mrb[8].mxu0 %v787_v57 }
 0x4ab   : > { %v893_v59 = vpop.f32.mrb[8].mxu0 }
 0x4ac   : > { %v894_v60 = vadd.f32 %v1037_v58, %v893_v59  ;;  %v1191_v61 = vpop.f32.mrb[9].mxu0 }
 0x4ad   : > { %v896_v62 = vpop.f32.mrb[10].mxu0 }
 0x4ae   : > { %900 = vst [vmem:[%s280_s20] sm:$0xff] %v894_v60  ;;  %v897_v63 = vadd.f32 %v1037_v58, %v896_v62  ;;  %v1192_v0 = vpop.f32.mrb[11].mxu0 }
 0x4b0   : > { %901 = vst [vmem:[%s280_s20 + $0x8] sm:$0xff] %v897_v63 }
 0x4b1 PF: > { %s17_s24 = sadd.s32 1, %s1265_s24  }
 0x4b2   : > { %p14_p4 = scmp.ge.s32.totalorder %s17_s24, 4  }
 0x4b4   :  { %16 = sbr.rel (!%p14_p4) target bundleno = 1 (0x1), region = 82 }

</bundles_post_ra>
